<compile_context>
chip_gen: v6e
topology: v6e:2x2x1
jax: 0.10.0
libtpu: 0.0.40
codegen_flags: <defaults>
</compile_context>

<pallas_src>
import jax
import jax.numpy as jnp
from jax.experimental import pallas as pl
from jax.experimental.pallas import tpu as pltpu

EPS = 1e-5


def basic_block_kernel(x_ref, w1_ref, w2_ref, p_ref,
                       g1_ref, b1_ref, g2_ref, b2_ref,
                       o_ref, xpad_ref, h1pad_ref):
    # x_ref    : (N, H, W*Cin)        unpadded input, W and C packed on the lane axis
    # w1_ref   : (3, W*Cin, W*Cout)   conv1 banded weights (one band per vertical tap)
    # w2_ref   : (3, W*Cout, W*Cout)  conv2 banded weights
    # p_ref    : (W*Cout, W*Cout)     channel aggregate+broadcast matrix, pre-scaled by 1/(N*H*W)
    # g*/b*    : (1, W*Cout)          BN affine params, pre-tiled over W
    # o_ref    : (N, H, W*Cout)
    # xpad_ref : (N, H+2, W*Cin)      VMEM scratch, H-halo padded input
    # h1pad_ref: (N, H+2, W*Cout)     VMEM scratch, H-halo padded intermediate
    N, H, WCin = x_ref.shape
    WCout = w1_ref.shape[-1]
    Hp = H + 2
    M = N * H

    # ---- build H-padded input in VMEM: zero only the 1-row halo, write interior once ----
    zrow_in = jnp.zeros((N, 1, WCin), jnp.float32)
    xpad_ref[:, 0:1, :] = zrow_in
    xpad_ref[:, Hp - 1:Hp, :] = zrow_in
    xpad_ref[:, 1:H + 1, :] = x_ref[...]

    # ---- conv1: 3 lane-dense matmuls (horizontal taps + W padding folded into bands) ----
    acc1 = jnp.zeros((M, WCout), jnp.float32)
    for ky in range(3):
        src = xpad_ref[:, ky:ky + H, :].reshape(M, WCin)
        acc1 += jnp.dot(src, w1_ref[ky], preferred_element_type=jnp.float32)

    # ---- bn1 (batch stats, fused sum / sum-of-squares) + relu ----
    s1 = jnp.sum(acc1, axis=0, keepdims=True)                       # (1, W*Cout)
    q1 = jnp.sum(acc1 * acc1, axis=0, keepdims=True)                # (1, W*Cout)
    agg1 = jnp.dot(jnp.concatenate([s1, q1], axis=0), p_ref[...],
                   preferred_element_type=jnp.float32)              # (2, W*Cout)
    mean1 = agg1[0:1, :]
    var1 = agg1[1:2, :] - mean1 * mean1
    scale1 = jax.lax.rsqrt(var1 + EPS) * g1_ref[...]
    h1 = jnp.maximum((acc1 - mean1) * scale1 + b1_ref[...], 0.0)

    # ---- H-pad the intermediate: halo rows zeroed, interior written once ----
    zrow_out = jnp.zeros((N, 1, WCout), jnp.float32)
    h1pad_ref[:, 0:1, :] = zrow_out
    h1pad_ref[:, Hp - 1:Hp, :] = zrow_out
    h1pad_ref[:, 1:H + 1, :] = h1.reshape(N, H, WCout)

    # ---- conv2 ----
    acc2 = jnp.zeros((M, WCout), jnp.float32)
    for ky in range(3):
        src = h1pad_ref[:, ky:ky + H, :].reshape(M, WCout)
        acc2 += jnp.dot(src, w2_ref[ky], preferred_element_type=jnp.float32)

    # ---- bn2 + residual add + relu ----
    s2 = jnp.sum(acc2, axis=0, keepdims=True)
    q2 = jnp.sum(acc2 * acc2, axis=0, keepdims=True)
    agg2 = jnp.dot(jnp.concatenate([s2, q2], axis=0), p_ref[...],
                   preferred_element_type=jnp.float32)
    mean2 = agg2[0:1, :]
    var2 = agg2[1:2, :] - mean2 * mean2
    scale2 = jax.lax.rsqrt(var2 + EPS) * g2_ref[...]
    h2 = (acc2 - mean2) * scale2 + b2_ref[...]

    residual = x_ref[...].reshape(M, WCin)                          # contiguous, no relayout
    o_ref[...] = jnp.maximum(h2 + residual, 0.0).reshape(N, H, WCout)


def _band_weights(w, W):
    """w: (3, 3, Cin, Cout) HWIO -> (3, W*Cin, W*Cout) banded matrices.

    Band[ky][w_in*Cin + ci, w_out*Cout + co] = w[ky, kx, ci, co] with
    kx = w_in - w_out + 1 when 0 <= kx <= 2, else 0.  The missing entries at
    the edges implement the zero padding along W.
    """
    _, _, Cin, Cout = w.shape
    bands = []
    for ky in range(3):
        b = jnp.zeros((W, W, Cin, Cout), w.dtype)                   # [w_in, w_out, ci, co]
        for kx in range(3):
            mask = jnp.eye(W, W, k=1 - kx, dtype=w.dtype)           # 1 where w_out = w_in + 1 - kx
            b = b + mask[:, :, None, None] * w[ky, kx][None, None, :, :]
        bands.append(b.transpose(0, 2, 1, 3).reshape(W * Cin, W * Cout))
    return jnp.stack(bands)


def basic_block_pallas(x_nchw, w1, w2, g1, b1, g2, b2):
    """x_nchw: (N, C, H, W) float32. Returns (N, C, H, W)."""
    N, C, H, W = x_nchw.shape
    Cin, Cout = w1.shape[2], w1.shape[3]
    assert Cin == C and Cout == C, "identity shortcut requires inplanes == planes"

    # lane-dense packed layout (N, H, W*C); for the test shape W*C == 128
    x_packed = jnp.transpose(x_nchw, (0, 2, 3, 1)).reshape(N, H, W * C)

    w1b = _band_weights(w1, W)                                      # (3, W*Cin, W*Cout)
    w2b = _band_weights(w2, W)                                      # (3, W*Cout, W*Cout)

    # channel aggregation + broadcast matrix, pre-scaled so  rowsum @ P == per-channel mean
    idx = jnp.arange(W * Cout)
    P = (idx[:, None] % Cout == idx[None, :] % Cout).astype(jnp.float32) / float(N * H * W)

    g1p = jnp.tile(g1, W).reshape(1, W * Cout)
    b1p = jnp.tile(b1, W).reshape(1, W * Cout)
    g2p = jnp.tile(g2, W).reshape(1, W * Cout)
    b2p = jnp.tile(b2, W).reshape(1, W * Cout)

    vmem = pl.BlockSpec(memory_space=pltpu.MemorySpace.VMEM)
    out_packed = pl.pallas_call(
        basic_block_kernel,
        out_shape=jax.ShapeDtypeStruct((N, H, W * Cout), jnp.float32),
        in_specs=[vmem] * 8,
        out_specs=vmem,
        scratch_shapes=[pltpu.VMEM((N, H + 2, W * Cin), jnp.float32),
                        pltpu.VMEM((N, H + 2, W * Cout), jnp.float32)],
    )(x_packed, w1b, w2b, P, g1p, b1p, g2p, b2p)

    return jnp.transpose(out_packed.reshape(N, H, W, Cout), (0, 3, 1, 2))


def basic_block_ref(x_nchw, w1, w2, g1, b1, g2, b2):
    """Plain-JAX reference matching PyTorch BasicBlock (train-mode BN)."""
    def conv(x, w):  # w is HWIO -> OIHW for lax
        return jax.lax.conv_general_dilated(
            x, jnp.transpose(w, (3, 2, 0, 1)), window_strides=(1, 1),
            padding=((1, 1), (1, 1)),
            dimension_numbers=('NCHW', 'OIHW', 'NCHW'))

    def bn(x, g, b):
        mean = jnp.mean(x, axis=(0, 2, 3), keepdims=True)
        var = jnp.mean((x - mean) ** 2, axis=(0, 2, 3), keepdims=True)
        return ((x - mean) * jax.lax.rsqrt(var + EPS)
                * g.reshape(1, -1, 1, 1) + b.reshape(1, -1, 1, 1))

    h = jax.nn.relu(bn(conv(x_nchw, w1), g1, b1))
    h = bn(conv(h, w2), g2, b2)
    return jax.nn.relu(h + x_nchw)


if __name__ == "__main__":
    N, C, H, W = 2, 8, 16, 16   # inplanes == planes == 8, stride=1, no downsample
    key = jax.random.PRNGKey(0)
    kx, kw1, kw2 = jax.random.split(key, 3)

    x = jax.random.normal(kx, (N, C, H, W), jnp.float32)
    # conv weights stored HWIO; deterministic random init (bias=False in module)
    w1 = jax.random.normal(kw1, (3, 3, C, C), jnp.float32) * 0.1
    w2 = jax.random.normal(kw2, (3, 3, C, C), jnp.float32) * 0.1
    # BatchNorm2d default init: weight=1, bias=0
    g1 = jnp.ones((C,), jnp.float32)
    b1 = jnp.zeros((C,), jnp.float32)
    g2 = jnp.ones((C,), jnp.float32)
    b2 = jnp.zeros((C,), jnp.float32)

    out = jax.block_until_ready(basic_block_pallas(x, w1, w2, g1, b1, g2, b2))
    ref = jax.block_until_ready(basic_block_ref(x, w1, w2, g1, b1, g2, b2))

    assert out.shape == (N, C, H, W)
    assert jnp.allclose(out, ref, atol=1e-4, rtol=1e-4), "mismatch vs reference"
    print("KERNEL_OK")
</pallas_src>

<mosaic_0001>
module attributes {stable_mosaic.version = 11 : i64} {
  func.func @basic_block_kernel(%arg0: memref<2x16x128xf32, #tpu.memory_space<vmem>>, %arg1: memref<3x128x128xf32, #tpu.memory_space<vmem>>, %arg2: memref<3x128x128xf32, #tpu.memory_space<vmem>>, %arg3: memref<128x128xf32, #tpu.memory_space<vmem>>, %arg4: memref<1x128xf32, #tpu.memory_space<vmem>>, %arg5: memref<1x128xf32, #tpu.memory_space<vmem>>, %arg6: memref<1x128xf32, #tpu.memory_space<vmem>>, %arg7: memref<1x128xf32, #tpu.memory_space<vmem>>, %arg8: memref<2x16x128xf32, #tpu.memory_space<vmem>>, %arg9: memref<2x18x128xf32, #tpu.memory_space<vmem>>, %arg10: memref<2x18x128xf32, #tpu.memory_space<vmem>>) attributes {dimension_semantics = [], scalar_prefetch = 0 : i64, scratch_operands = 2 : i64, tpu.core_type = #tpu.core_type<tc>} {
    %cst = arith.constant 0.000000e+00 : f32
    %0 = vector.broadcast %cst : f32 to vector<2x1x128xf32>
    %c0 = arith.constant 0 : index
    %c0_0 = arith.constant 0 : index
    %c0_1 = arith.constant 0 : index
    %1 = vector.load %arg9[%c0, %c0_0, %c0_1] : memref<2x18x128xf32, #tpu.memory_space<vmem>>, vector<2x1x128xf32>
    tpu.vector_store %arg9[%c0, %c0_0, %c0_1], %0 {strides = array<i32>} : memref<2x18x128xf32, #tpu.memory_space<vmem>>, vector<2x1x128xf32>,
    %c0_2 = arith.constant 0 : index
    %c17 = arith.constant 17 : index
    %c0_3 = arith.constant 0 : index
    %2 = vector.load %arg9[%c0_2, %c17, %c0_3] : memref<2x18x128xf32, #tpu.memory_space<vmem>>, vector<2x1x128xf32>
    tpu.vector_store %arg9[%c0_2, %c17, %c0_3], %0 {strides = array<i32>} : memref<2x18x128xf32, #tpu.memory_space<vmem>>, vector<2x1x128xf32>,
    %c0_4 = arith.constant 0 : index
    %c0_5 = arith.constant 0 : index
    %c0_6 = arith.constant 0 : index
    %3 = vector.load %arg0[%c0_4, %c0_5, %c0_6] : memref<2x16x128xf32, #tpu.memory_space<vmem>>, vector<2x16x128xf32>
    %c0_7 = arith.constant 0 : index
    %c1 = arith.constant 1 : index
    %c0_8 = arith.constant 0 : index
    %4 = vector.load %arg9[%c0_7, %c1, %c0_8] : memref<2x18x128xf32, #tpu.memory_space<vmem>>, vector<2x16x128xf32>
    tpu.vector_store %arg9[%c0_7, %c1, %c0_8], %3 {strides = array<i32>} : memref<2x18x128xf32, #tpu.memory_space<vmem>>, vector<2x16x128xf32>,
    %cst_9 = arith.constant 0.000000e+00 : f32
    %5 = vector.broadcast %cst_9 : f32 to vector<32x128xf32>
    %c0_10 = arith.constant 0 : index
    %c0_11 = arith.constant 0 : index
    %c0_12 = arith.constant 0 : index
    %6 = vector.load %arg9[%c0_10, %c0_11, %c0_12] : memref<2x18x128xf32, #tpu.memory_space<vmem>>, vector<2x16x128xf32>
    %7 = vector.shape_cast %6 : vector<2x16x128xf32> to vector<32x128xf32>
    %c0_13 = arith.constant 0 : index
    %c0_14 = arith.constant 0 : index
    %c0_15 = arith.constant 0 : index
    %8 = vector.load %arg1[%c0_13, %c0_14, %c0_15] : memref<3x128x128xf32, #tpu.memory_space<vmem>>, vector<1x128x128xf32>
    %9 = vector.shape_cast %8 : vector<1x128x128xf32> to vector<128x128xf32>
    %cst_16 = arith.constant dense<0.000000e+00> : vector<32x128xf32>
    %10 = tpu.matmul %7, %9, %cst_16 {dimension_numbers = #tpu.dot_dimension_numbers<[1], [0], [0], [1], [0, 0, 1, 1], [], []>} : vector<32x128xf32>, vector<128x128xf32>, vector<32x128xf32> -> vector<32x128xf32>
    %11 = arith.addf %5, %10 : vector<32x128xf32>
    %c0_17 = arith.constant 0 : index
    %c1_18 = arith.constant 1 : index
    %c0_19 = arith.constant 0 : index
    %12 = vector.load %arg9[%c0_17, %c1_18, %c0_19] : memref<2x18x128xf32, #tpu.memory_space<vmem>>, vector<2x16x128xf32>
    %13 = vector.shape_cast %12 : vector<2x16x128xf32> to vector<32x128xf32>
    %c1_20 = arith.constant 1 : index
    %c0_21 = arith.constant 0 : index
    %c0_22 = arith.constant 0 : index
    %14 = vector.load %arg1[%c1_20, %c0_21, %c0_22] : memref<3x128x128xf32, #tpu.memory_space<vmem>>, vector<1x128x128xf32>
    %15 = vector.shape_cast %14 : vector<1x128x128xf32> to vector<128x128xf32>
    %cst_23 = arith.constant dense<0.000000e+00> : vector<32x128xf32>
    %16 = tpu.matmul %13, %15, %cst_23 {dimension_numbers = #tpu.dot_dimension_numbers<[1], [0], [0], [1], [0, 0, 1, 1], [], []>} : vector<32x128xf32>, vector<128x128xf32>, vector<32x128xf32> -> vector<32x128xf32>
    %17 = arith.addf %11, %16 : vector<32x128xf32>
    %c0_24 = arith.constant 0 : index
    %c2 = arith.constant 2 : index
    %c0_25 = arith.constant 0 : index
    %18 = vector.load %arg9[%c0_24, %c2, %c0_25] : memref<2x18x128xf32, #tpu.memory_space<vmem>>, vector<2x16x128xf32>
    %19 = vector.shape_cast %18 : vector<2x16x128xf32> to vector<32x128xf32>
    %c2_26 = arith.constant 2 : index
    %c0_27 = arith.constant 0 : index
    %c0_28 = arith.constant 0 : index
    %20 = vector.load %arg1[%c2_26, %c0_27, %c0_28] : memref<3x128x128xf32, #tpu.memory_space<vmem>>, vector<1x128x128xf32>
    %21 = vector.shape_cast %20 : vector<1x128x128xf32> to vector<128x128xf32>
    %cst_29 = arith.constant dense<0.000000e+00> : vector<32x128xf32>
    %22 = tpu.matmul %19, %21, %cst_29 {dimension_numbers = #tpu.dot_dimension_numbers<[1], [0], [0], [1], [0, 0, 1, 1], [], []>} : vector<32x128xf32>, vector<128x128xf32>, vector<32x128xf32> -> vector<32x128xf32>
    %23 = arith.addf %17, %22 : vector<32x128xf32>
    %cst_30 = arith.constant dense<0.000000e+00> : vector<128xf32>
    %24 = vector.multi_reduction <add>, %23, %cst_30 [0] : vector<32x128xf32> to vector<128xf32>
    %25 = vector.shape_cast %24 : vector<128xf32> to vector<1x128xf32>
    %26 = arith.mulf %23, %23 : vector<32x128xf32>
    %cst_31 = arith.constant dense<0.000000e+00> : vector<128xf32>
    %27 = vector.multi_reduction <add>, %26, %cst_31 [0] : vector<32x128xf32> to vector<128xf32>
    %28 = vector.shape_cast %27 : vector<128xf32> to vector<1x128xf32>
    %29 = tpu.concatenate %25, %28 in 0 : vector<1x128xf32>, vector<1x128xf32> -> vector<2x128xf32>
    %c0_32 = arith.constant 0 : index
    %c0_33 = arith.constant 0 : index
    %30 = vector.load %arg3[%c0_32, %c0_33] : memref<128x128xf32, #tpu.memory_space<vmem>>, vector<128x128xf32>
    %cst_34 = arith.constant dense<0.000000e+00> : vector<2x128xf32>
    %31 = tpu.matmul %29, %30, %cst_34 {dimension_numbers = #tpu.dot_dimension_numbers<[1], [0], [0], [1], [0, 0, 1, 1], [], []>} : vector<2x128xf32>, vector<128x128xf32>, vector<2x128xf32> -> vector<2x128xf32>
    %32 = vector.extract_strided_slice %31 {offsets = [0, 0], sizes = [1, 128], strides = [1, 1]} : vector<2x128xf32> to vector<1x128xf32>
    %33 = vector.extract_strided_slice %31 {offsets = [1, 0], sizes = [1, 128], strides = [1, 1]} : vector<2x128xf32> to vector<1x128xf32>
    %34 = arith.mulf %32, %32 : vector<1x128xf32>
    %35 = arith.subf %33, %34 : vector<1x128xf32>
    %cst_35 = arith.constant 9.99999974E-6 : f32
    %36 = vector.broadcast %cst_35 : f32 to vector<1x128xf32>
    %37 = arith.addf %35, %36 : vector<1x128xf32>
    %38 = math.rsqrt %37 : vector<1x128xf32>
    %c0_36 = arith.constant 0 : index
    %c0_37 = arith.constant 0 : index
    %39 = vector.load %arg4[%c0_36, %c0_37] : memref<1x128xf32, #tpu.memory_space<vmem>>, vector<1x128xf32>
    %40 = arith.mulf %38, %39 : vector<1x128xf32>
    %41 = vector.broadcast %32 : vector<1x128xf32> to vector<32x128xf32>
    %42 = arith.subf %23, %41 : vector<32x128xf32>
    %43 = vector.broadcast %40 : vector<1x128xf32> to vector<32x128xf32>
    %44 = arith.mulf %42, %43 : vector<32x128xf32>
    %c0_38 = arith.constant 0 : index
    %c0_39 = arith.constant 0 : index
    %45 = vector.load %arg5[%c0_38, %c0_39] : memref<1x128xf32, #tpu.memory_space<vmem>>, vector<1x128xf32>
    %46 = vector.broadcast %45 : vector<1x128xf32> to vector<32x128xf32>
    %47 = arith.addf %44, %46 : vector<32x128xf32>
    %cst_40 = arith.constant 0.000000e+00 : f32
    %48 = vector.broadcast %cst_40 : f32 to vector<32x128xf32>
    %49 = arith.maximumf %47, %48 : vector<32x128xf32>
    %cst_41 = arith.constant 0.000000e+00 : f32
    %50 = vector.broadcast %cst_41 : f32 to vector<2x1x128xf32>
    %c0_42 = arith.constant 0 : index
    %c0_43 = arith.constant 0 : index
    %c0_44 = arith.constant 0 : index
    %51 = vector.load %arg10[%c0_42, %c0_43, %c0_44] : memref<2x18x128xf32, #tpu.memory_space<vmem>>, vector<2x1x128xf32>
    tpu.vector_store %arg10[%c0_42, %c0_43, %c0_44], %50 {strides = array<i32>} : memref<2x18x128xf32, #tpu.memory_space<vmem>>, vector<2x1x128xf32>,
    %c0_45 = arith.constant 0 : index
    %c17_46 = arith.constant 17 : index
    %c0_47 = arith.constant 0 : index
    %52 = vector.load %arg10[%c0_45, %c17_46, %c0_47] : memref<2x18x128xf32, #tpu.memory_space<vmem>>, vector<2x1x128xf32>
    tpu.vector_store %arg10[%c0_45, %c17_46, %c0_47], %50 {strides = array<i32>} : memref<2x18x128xf32, #tpu.memory_space<vmem>>, vector<2x1x128xf32>,
    %53 = vector.shape_cast %49 : vector<32x128xf32> to vector<2x16x128xf32>
    %c0_48 = arith.constant 0 : index
    %c1_49 = arith.constant 1 : index
    %c0_50 = arith.constant 0 : index
    %54 = vector.load %arg10[%c0_48, %c1_49, %c0_50] : memref<2x18x128xf32, #tpu.memory_space<vmem>>, vector<2x16x128xf32>
    tpu.vector_store %arg10[%c0_48, %c1_49, %c0_50], %53 {strides = array<i32>} : memref<2x18x128xf32, #tpu.memory_space<vmem>>, vector<2x16x128xf32>,
    %cst_51 = arith.constant 0.000000e+00 : f32
    %55 = vector.broadcast %cst_51 : f32 to vector<32x128xf32>
    %c0_52 = arith.constant 0 : index
    %c0_53 = arith.constant 0 : index
    %c0_54 = arith.constant 0 : index
    %56 = vector.load %arg10[%c0_52, %c0_53, %c0_54] : memref<2x18x128xf32, #tpu.memory_space<vmem>>, vector<2x16x128xf32>
    %57 = vector.shape_cast %56 : vector<2x16x128xf32> to vector<32x128xf32>
    %c0_55 = arith.constant 0 : index
    %c0_56 = arith.constant 0 : index
    %c0_57 = arith.constant 0 : index
    %58 = vector.load %arg2[%c0_55, %c0_56, %c0_57] : memref<3x128x128xf32, #tpu.memory_space<vmem>>, vector<1x128x128xf32>
    %59 = vector.shape_cast %58 : vector<1x128x128xf32> to vector<128x128xf32>
    %cst_58 = arith.constant dense<0.000000e+00> : vector<32x128xf32>
    %60 = tpu.matmul %57, %59, %cst_58 {dimension_numbers = #tpu.dot_dimension_numbers<[1], [0], [0], [1], [0, 0, 1, 1], [], []>} : vector<32x128xf32>, vector<128x128xf32>, vector<32x128xf32> -> vector<32x128xf32>
    %61 = arith.addf %55, %60 : vector<32x128xf32>
    %c0_59 = arith.constant 0 : index
    %c1_60 = arith.constant 1 : index
    %c0_61 = arith.constant 0 : index
    %62 = vector.load %arg10[%c0_59, %c1_60, %c0_61] : memref<2x18x128xf32, #tpu.memory_space<vmem>>, vector<2x16x128xf32>
    %63 = vector.shape_cast %62 : vector<2x16x128xf32> to vector<32x128xf32>
    %c1_62 = arith.constant 1 : index
    %c0_63 = arith.constant 0 : index
    %c0_64 = arith.constant 0 : index
    %64 = vector.load %arg2[%c1_62, %c0_63, %c0_64] : memref<3x128x128xf32, #tpu.memory_space<vmem>>, vector<1x128x128xf32>
    %65 = vector.shape_cast %64 : vector<1x128x128xf32> to vector<128x128xf32>
    %cst_65 = arith.constant dense<0.000000e+00> : vector<32x128xf32>
    %66 = tpu.matmul %63, %65, %cst_65 {dimension_numbers = #tpu.dot_dimension_numbers<[1], [0], [0], [1], [0, 0, 1, 1], [], []>} : vector<32x128xf32>, vector<128x128xf32>, vector<32x128xf32> -> vector<32x128xf32>
    %67 = arith.addf %61, %66 : vector<32x128xf32>
    %c0_66 = arith.constant 0 : index
    %c2_67 = arith.constant 2 : index
    %c0_68 = arith.constant 0 : index
    %68 = vector.load %arg10[%c0_66, %c2_67, %c0_68] : memref<2x18x128xf32, #tpu.memory_space<vmem>>, vector<2x16x128xf32>
    %69 = vector.shape_cast %68 : vector<2x16x128xf32> to vector<32x128xf32>
    %c2_69 = arith.constant 2 : index
    %c0_70 = arith.constant 0 : index
    %c0_71 = arith.constant 0 : index
    %70 = vector.load %arg2[%c2_69, %c0_70, %c0_71] : memref<3x128x128xf32, #tpu.memory_space<vmem>>, vector<1x128x128xf32>
    %71 = vector.shape_cast %70 : vector<1x128x128xf32> to vector<128x128xf32>
    %cst_72 = arith.constant dense<0.000000e+00> : vector<32x128xf32>
    %72 = tpu.matmul %69, %71, %cst_72 {dimension_numbers = #tpu.dot_dimension_numbers<[1], [0], [0], [1], [0, 0, 1, 1], [], []>} : vector<32x128xf32>, vector<128x128xf32>, vector<32x128xf32> -> vector<32x128xf32>
    %73 = arith.addf %67, %72 : vector<32x128xf32>
    %cst_73 = arith.constant dense<0.000000e+00> : vector<128xf32>
    %74 = vector.multi_reduction <add>, %73, %cst_73 [0] : vector<32x128xf32> to vector<128xf32>
    %75 = vector.shape_cast %74 : vector<128xf32> to vector<1x128xf32>
    %76 = arith.mulf %73, %73 : vector<32x128xf32>
    %cst_74 = arith.constant dense<0.000000e+00> : vector<128xf32>
    %77 = vector.multi_reduction <add>, %76, %cst_74 [0] : vector<32x128xf32> to vector<128xf32>
    %78 = vector.shape_cast %77 : vector<128xf32> to vector<1x128xf32>
    %79 = tpu.concatenate %75, %78 in 0 : vector<1x128xf32>, vector<1x128xf32> -> vector<2x128xf32>
    %c0_75 = arith.constant 0 : index
    %c0_76 = arith.constant 0 : index
    %80 = vector.load %arg3[%c0_75, %c0_76] : memref<128x128xf32, #tpu.memory_space<vmem>>, vector<128x128xf32>
    %cst_77 = arith.constant dense<0.000000e+00> : vector<2x128xf32>
    %81 = tpu.matmul %79, %80, %cst_77 {dimension_numbers = #tpu.dot_dimension_numbers<[1], [0], [0], [1], [0, 0, 1, 1], [], []>} : vector<2x128xf32>, vector<128x128xf32>, vector<2x128xf32> -> vector<2x128xf32>
    %82 = vector.extract_strided_slice %81 {offsets = [0, 0], sizes = [1, 128], strides = [1, 1]} : vector<2x128xf32> to vector<1x128xf32>
    %83 = vector.extract_strided_slice %81 {offsets = [1, 0], sizes = [1, 128], strides = [1, 1]} : vector<2x128xf32> to vector<1x128xf32>
    %84 = arith.mulf %82, %82 : vector<1x128xf32>
    %85 = arith.subf %83, %84 : vector<1x128xf32>
    %cst_78 = arith.constant 9.99999974E-6 : f32
    %86 = vector.broadcast %cst_78 : f32 to vector<1x128xf32>
    %87 = arith.addf %85, %86 : vector<1x128xf32>
    %88 = math.rsqrt %87 : vector<1x128xf32>
    %c0_79 = arith.constant 0 : index
    %c0_80 = arith.constant 0 : index
    %89 = vector.load %arg6[%c0_79, %c0_80] : memref<1x128xf32, #tpu.memory_space<vmem>>, vector<1x128xf32>
    %90 = arith.mulf %88, %89 : vector<1x128xf32>
    %91 = vector.broadcast %82 : vector<1x128xf32> to vector<32x128xf32>
    %92 = arith.subf %73, %91 : vector<32x128xf32>
    %93 = vector.broadcast %90 : vector<1x128xf32> to vector<32x128xf32>
    %94 = arith.mulf %92, %93 : vector<32x128xf32>
    %c0_81 = arith.constant 0 : index
    %c0_82 = arith.constant 0 : index
    %95 = vector.load %arg7[%c0_81, %c0_82] : memref<1x128xf32, #tpu.memory_space<vmem>>, vector<1x128xf32>
    %96 = vector.broadcast %95 : vector<1x128xf32> to vector<32x128xf32>
    %97 = arith.addf %94, %96 : vector<32x128xf32>
    %c0_83 = arith.constant 0 : index
    %c0_84 = arith.constant 0 : index
    %c0_85 = arith.constant 0 : index
    %98 = vector.load %arg0[%c0_83, %c0_84, %c0_85] : memref<2x16x128xf32, #tpu.memory_space<vmem>>, vector<2x16x128xf32>
    %99 = vector.shape_cast %98 : vector<2x16x128xf32> to vector<32x128xf32>
    %100 = arith.addf %97, %99 : vector<32x128xf32>
    %cst_86 = arith.constant 0.000000e+00 : f32
    %101 = vector.broadcast %cst_86 : f32 to vector<32x128xf32>
    %102 = arith.maximumf %100, %101 : vector<32x128xf32>
    %103 = vector.shape_cast %102 : vector<32x128xf32> to vector<2x16x128xf32>
    %c0_87 = arith.constant 0 : index
    %c0_88 = arith.constant 0 : index
    %c0_89 = arith.constant 0 : index
    %104 = vector.load %arg8[%c0_87, %c0_88, %c0_89] : memref<2x16x128xf32, #tpu.memory_space<vmem>>, vector<2x16x128xf32>
    tpu.vector_store %arg8[%c0_87, %c0_88, %c0_89], %103 {strides = array<i32>} : memref<2x16x128xf32, #tpu.memory_space<vmem>>, vector<2x16x128xf32>,
    return
  }
}

</mosaic_0001>

<bundles_post_ra>
// kernel: tpu_custom_call.1
= control target key start
LH: loop header
LB: loop body
LE: loop exit
PB: predicated region body
PF: predicated region fallthrough
CT: control target
= control target key end

     0   :  { %13 = vsyncpa [#allocation5], 0  ;;  %s1924_s0 = inlined_call_operand.hbm [shape: f32[2,16,128], index: 0, kind: input, shape index: {}]   ;;  %s1925_s1 = inlined_call_operand.hbm [shape: f32[3,128,128], index: 1, kind: input, shape index: {}]   ;;  %s1926_s2 = inlined_call_operand.hbm [shape: f32[3,128,128], index: 2, kind: input, shape index: {}]   ;;  %s1927_s3 = inlined_call_operand.hbm [shape: f32[128,128], index: 3, kind: input, shape index: {}]   ;;  %s1928_s4 = inlined_call_operand.vmem [shape: f32[1,128], index: 4, kind: input, shape index: {}]   ;;  %s1929_s5 = inlined_call_operand.vmem [shape: f32[1,128], index: 5, kind: input, shape index: {}]   ;;  %s1930_s6 = inlined_call_operand.vmem [shape: f32[1,128], index: 6, kind: input, shape index: {}]   ;;  %s1931_s7 = inlined_call_operand.vmem [shape: f32[1,128], index: 7, kind: input, shape index: {}]   ;;  %s1932_s8 = inlined_call_operand.hbm [shape: f32[2,16,128], index: 8, kind: output, shape index: {}]  }
   0x1   :  { %14 = vsyncpa [#allocation8], 0 }
   0x2   :  { %15 = vsyncpa [#allocation11], 0 }
   0x3   :  { %16 = vsyncpa [#allocation6], 0  ;;  %s1670_s27 = smov [#allocation7]   ;;  %s1671_s29 = smov [#allocation4]  }
   0x4   :  { %s34_s28 = sshll.u32 %s1670_s27, 4  ;;  %s22_s30 = sshll.u32 %s1671_s29, 4  ;;  %s35_s28 = int_to_ptr.vmem [resolvable:$true] %s34_s28  ;;  %s23_s30 = int_to_ptr.vmem [resolvable:$true] %s22_s30 }
   0x5   :  { %s1570_s9 = scalar_lea.vmem %s35_s28, 6144  ;;  %p1575_p1 = scmp.lt.s32.totalorder %s35_s28, %s35_s28 }
   0x6   :  { %p1571_p0 = scmp.ne.s32.totalorder %s35_s28, %s1570_s9  ;;  %p1576_p2 = scmp.lt.s32.totalorder %s1570_s9, %s1570_s9 }
   0x8   :  { %p1577_p3 = por %p1576_p2, %p1575_p1 }
   0xa   :  { %p1578_p4 = pnand %p1577_p3, %p1571_p0 }
   0xc   :  { %1581 = shalt.err (!%p1578_p4)
}
   0xd   :  { %s1672_s10 = smov 128   ;;  %s1673_s11 = smov 8  }
   0xe   :  { %40 = dma.hbm_to_vmem [thread:$0]  %s1925_s1, 6144, %s35_s28, [#allocation8], %s1672_s10, %s1672_s10, %s1673_s11  }
   0xf   :  { %s1590_s14 = scalar_lea.vmem %s23_s30, 512  ;;  %p1595_p6 = scmp.lt.s32.totalorder %s23_s30, %s23_s30 }
  0x10   :  { %p1591_p5 = scmp.ne.s32.totalorder %s23_s30, %s1590_s14  ;;  %p1596_p7 = scmp.lt.s32.totalorder %s1590_s14, %s1590_s14 }
  0x12   :  { %p1597_p8 = por %p1596_p7, %p1595_p6 }
  0x14   :  { %p1598_p9 = pnand %p1597_p8, %p1591_p5 }
  0x16   :  { %1601 = shalt.err (!%p1598_p9)
}
  0x17   :  { %28 = dma.hbm_to_vmem [thread:$0]  %s1924_s0, 512, %s23_s30, [#allocation5], %s1672_s10, %s1672_s10, %s1673_s11  }
  0x18   :  { %s1674_s17 = smov [#allocation9]   ;;  %s1675_s19 = smov [#allocation10]  }
  0x19   :  { %s46_s18 = sshll.u32 %s1674_s17, 4  ;;  %s58_s20 = sshll.u32 %s1675_s19, 4  ;;  %s47_s18 = int_to_ptr.vmem [resolvable:$true] %s46_s18  ;;  %s59_s20 = int_to_ptr.vmem [resolvable:$true] %s58_s20 }
  0x1a   :  { %s1610_s1 = scalar_lea.vmem %s47_s18, 6144  ;;  %p1615_p11 = scmp.lt.s32.totalorder %s47_s18, %s47_s18 }
  0x1b   :  { %p1611_p10 = scmp.ne.s32.totalorder %s47_s18, %s1610_s1  ;;  %p1616_p12 = scmp.lt.s32.totalorder %s1610_s1, %s1610_s1 }
  0x1d   :  { %p1617_p13 = por %p1616_p12, %p1615_p11 }
  0x1f   :  { %p1618_p0 = pnand %p1617_p13, %p1611_p10 }
  0x21   :  { %1621 = shalt.err (!%p1618_p0)
}
  0x22   :  { %52 = dma.hbm_to_vmem [thread:$0]  %s1926_s2, 6144, %s47_s18, [#allocation8], %s1672_s10, %s1672_s10, %s1673_s11  }
  0x23   :  { %s1630_s0 = scalar_lea.vmem %s59_s20, 2048  ;;  %p1635_p2 = scmp.lt.s32.totalorder %s59_s20, %s59_s20 }
  0x24   :  { %p1631_p1 = scmp.ne.s32.totalorder %s59_s20, %s1630_s0  ;;  %p1636_p3 = scmp.lt.s32.totalorder %s1630_s0, %s1630_s0 }
  0x26   :  { %p1637_p4 = por %p1636_p3, %p1635_p2 }
  0x28   :  { %p1638_p5 = pnand %p1637_p4, %p1631_p1 }
  0x2a   :  { %1641 = shalt.err (!%p1638_p5)
}
  0x2b   :  { %64 = dma.hbm_to_vmem [thread:$0]  %s1927_s3, 2048, %s59_s20, [#allocation11], %s1672_s10, %s1672_s10, %s1673_s11  }
  0x2c   :  { %1662 = dma.done.wait [#allocation5], 512  }
  0x2d   :  { %1663 = vsyncadd [#allocation5], 4294966784 }
  0x2e   :  { %1664 = dma.done.wait [#allocation8], 12288  }
  0x2f   :  { %1665 = vsyncadd [#allocation8], 4294955008 }
  0x30   :  { %1666 = dma.done.wait [#allocation11], 2048  }
  0x31   :  { %1667 = vsyncadd [#allocation11], 4294965248  ;;  %v1676_v0 = vmov 0.0   ;;  %v137_v1 = vld [vmem:[#allocation7 + $0xf8] sm:$0xff]  ;;  %v136_v3 = vld [vmem:[#allocation7 + $0xf0] sm:$0xff]  ;;  %vm1677_vm0 = vmmov 0  }
  0x32   :  { %85 = vst [vmem:[#allocation2] sm:$0x1] %v1676_v0  ;;  %86 = vst [vmem:[#allocation2 + $0x18] sm:$0x1] %v1676_v0  ;;  %v116_v2 = vld [vmem:[#allocation7 + $0x78] sm:$0xff]  ;;  %1247 = vmatprep.subr.mxu0 %v137_v1  ;;  %v115_v4 = vld [vmem:[#allocation7 + $0x70] sm:$0xff] }
  0x33   :  { %87 = vst [vmem:[#allocation2 + $0x11] sm:$0x1] %v1676_v0  ;;  %88 = vst [vmem:[#allocation2 + $0x29] sm:$0x1] %v1676_v0  ;;  %1285 = vmatprep.subr.mxu1 %v116_v2  ;;  %1248 = vmatpush3.msra.mxu0 %v137_v1  ;;  %v135_v5 = vld [vmem:[#allocation7 + $0xe8] sm:$0xff]  ;;  %v134_v7 = vld [vmem:[#allocation7 + $0xe0] sm:$0xff] }
  0x34   :  { %574 = vst [vmem:[#allocation3] sm:$0x1] %v1676_v0  ;;  %575 = vst [vmem:[#allocation3 + $0x18] sm:$0x1] %v1676_v0  ;;  %1286 = vmatpush3.msra.mxu1 %v116_v2  ;;  %v114_v6 = vld [vmem:[#allocation7 + $0x68] sm:$0xff]  ;;  %1249 = vmatprep.subr.mxu0 %v136_v3  ;;  %v113_v8 = vld [vmem:[#allocation7 + $0x60] sm:$0xff] }
  0x35   :  { %576 = vst [vmem:[#allocation3 + $0x11] sm:$0x1] %v1676_v0  ;;  %577 = vst [vmem:[#allocation3 + $0x29] sm:$0x1] %v1676_v0  ;;  %1287 = vmatprep.subr.mxu1 %v115_v4  ;;  %1250 = vmatpush3.msra.mxu0 %v136_v3  ;;  %v133_v9 = vld [vmem:[#allocation7 + $0xd8] sm:$0xff]  ;;  %v132_v11 = vld [vmem:[#allocation7 + $0xd0] sm:$0xff] }
  0x36   :  { %1288 = vmatpush3.msra.mxu1 %v115_v4  ;;  %1251 = vmatprep.subr.mxu0 %v135_v5  ;;  %v112_v10 = vld [vmem:[#allocation7 + $0x58] sm:$0xff]  ;;  %v111_v12 = vld [vmem:[#allocation7 + $0x50] sm:$0xff]  ;;  %v131_v13 = vld [vmem:[#allocation7 + $0xc8] sm:$0xff]  ;;  %vm440_vm1 = vcmask 1040384  }
  0x37   :  { %1289 = vmatprep.subr.mxu1 %v114_v6  ;;  %1252 = vmatpush3.msra.mxu0 %v135_v5  ;;  %v110_v14 = vld [vmem:[#allocation7 + $0x48] sm:$0xff]  ;;  %v1756_v15 = vld [vmem:[#allocation4] sm:$0xff]  ;;  %v129_v19 = vld [vmem:[#allocation7 + $0xb8] sm:$0xff] }
  0x38   :  { %1290 = vmatpush3.msra.mxu1 %v114_v6  ;;  %1253 = vmatprep.subr.mxu0 %v134_v7  ;;  %93 = vst [vmem:[#allocation2 + $0x1] sm:$0xff] %v1756_v15  ;;  %v1759_v16 = vld [vmem:[#allocation4 + $0x8] sm:$0xff]  ;;  %v130_v17 = vld [vmem:[#allocation7 + $0xc0] sm:$0xff]  ;;  %v108_v20 = vld [vmem:[#allocation7 + $0x38] sm:$0xff] }
  0x39   :  { %1291 = vmatprep.subr.mxu1 %v113_v8  ;;  %1254 = vmatpush3.msra.mxu0 %v134_v7  ;;  %v109_v18 = vld [vmem:[#allocation7 + $0x40] sm:$0xff]  ;;  %94 = vst [vmem:[#allocation2 + $0x9] sm:$0xff] %v1759_v16  ;;  %v91_v21 = vld [vmem:[#allocation4 + $0x10] sm:$0xff]  ;;  %v1762_v24 = vld [vmem:[#allocation4 + $0x18] sm:$0xff] }
  0x3a   :  { %1292 = vmatpush3.msra.mxu1 %v113_v8  ;;  %1255 = vmatprep.subr.mxu0 %v133_v9  ;;  %v128_v22 = vld [vmem:[#allocation7 + $0xb0] sm:$0xff]  ;;  %95 = vst [vmem:[#allocation2 + $0x19] sm:$0xff] %v91_v21  ;;  %96 = vst [vmem:[#allocation2 + $0x21] sm:$0xff] %v1762_v24  ;;  %v127_v25 = vld [vmem:[#allocation7 + $0xa8] sm:$0xff] }
  0x3b   :  { %1293 = vmatprep.subr.mxu1 %v112_v10  ;;  %1256 = vmatpush3.msra.mxu0 %v133_v9  ;;  %v107_v23 = vld [vmem:[#allocation7 + $0x30] sm:$0xff]  ;;  %v106_v26 = vld [vmem:[#allocation7 + $0x28] sm:$0xff]  ;;  %v126_v27 = vld [vmem:[#allocation7 + $0xa0] sm:$0xff] }
  0x3c   :  { %1294 = vmatpush3.msra.mxu1 %v112_v10  ;;  %1257 = vmatprep.subr.mxu0 %v132_v11  ;;  %v105_v28 = vld [vmem:[#allocation7 + $0x20] sm:$0xff]  ;;  %v125_v29 = vld [vmem:[#allocation7 + $0x98] sm:$0xff]  ;;  %v124_v31 = vld [vmem:[#allocation7 + $0x90] sm:$0xff] }
  0x3d   :  { %1295 = vmatprep.subr.mxu1 %v111_v12  ;;  %1258 = vmatpush3.msra.mxu0 %v132_v11  ;;  %v104_v30 = vld [vmem:[#allocation7 + $0x18] sm:$0xff]  ;;  %v103_v32 = vld [vmem:[#allocation7 + $0x10] sm:$0xff]  ;;  %v123_v33 = vld [vmem:[#allocation7 + $0x88] sm:$0xff] }
  0x3e   :  { %1296 = vmatpush3.msra.mxu1 %v111_v12  ;;  %1259 = vmatprep.subr.mxu0 %v131_v13  ;;  %v102_v34 = vld [vmem:[#allocation7 + $0x8] sm:$0xff]  ;;  %v122_v35 = vld [vmem:[#allocation7 + $0x80] sm:$0xff]  ;;  %v328_v39 = vld [vmem:[#allocation7 + $0x178] sm:$0xff] }
  0x3f   :  { %1297 = vmatprep.subr.mxu1 %v110_v14  ;;  %1260 = vmatpush3.msra.mxu0 %v131_v13  ;;  %v101_v36 = vld [vmem:[#allocation7] sm:$0xff]  ;;  %v327_v41 = vld [vmem:[#allocation7 + $0x170] sm:$0xff]  ;;  %v326_v43 = vld [vmem:[#allocation7 + $0x168] sm:$0xff] }
  0x40   :  { %1298 = vmatpush3.msra.mxu1 %v110_v14  ;;  %1261 = vmatprep.subr.mxu0 %v130_v17  ;;  %v97_v37 = vld [vmem:[#allocation2] sm:$0xff]  ;;  %v98_v38 = vld [vmem:[#allocation2 + $0x8] sm:$0xff]  ;;  %v324_v46 = vld [vmem:[#allocation7 + $0x158] sm:$0xff] }
  0x41   :  { %1299 = vmatprep.subr.mxu1 %v109_v18  ;;  %1262 = vmatpush3.msra.mxu0 %v130_v17  ;;  %v99_v40 = vld [vmem:[#allocation2 + $0x18] sm:$0xff]  ;;  %v100_v42 = vld [vmem:[#allocation2 + $0x20] sm:$0xff]  ;;  %v323_v47 = vld [vmem:[#allocation7 + $0x150] sm:$0xff] }
  0x42   :  { %1300 = vmatpush3.msra.mxu1 %v109_v18  ;;  %1263 = vmatprep.subr.mxu0 %v129_v19  ;;  %v308_v44 = vld [vmem:[#allocation2 + $0x2] sm:$0xff]  ;;  %v320_v50 = vld [vmem:[#allocation7 + $0x138] sm:$0xff]  ;;  %v319_v51 = vld [vmem:[#allocation7 + $0x130] sm:$0xff] }
  0x43   :  { %1301 = vmatprep.subr.mxu1 %v108_v20  ;;  %1264 = vmatpush3.msra.mxu0 %v129_v19  ;;  %v325_v45 = vld [vmem:[#allocation7 + $0x160] sm:$0xff]  ;;  %v322_v48 = vld [vmem:[#allocation7 + $0x148] sm:$0xff]  ;;  %v316_v54 = vld [vmem:[#allocation7 + $0x118] sm:$0xff] }
  0x44   :  { %1302 = vmatpush3.msra.mxu1 %v108_v20  ;;  %1265 = vmatprep.subr.mxu0 %v128_v22  ;;  %v321_v49 = vld [vmem:[#allocation7 + $0x140] sm:$0xff]  ;;  %v318_v52 = vld [vmem:[#allocation7 + $0x128] sm:$0xff]  ;;  %v315_v55 = vld [vmem:[#allocation7 + $0x110] sm:$0xff] }
  0x45   :  { %1303 = vmatprep.subr.mxu1 %v107_v23  ;;  %1266 = vmatpush3.msra.mxu0 %v128_v22  ;;  %v317_v53 = vld [vmem:[#allocation7 + $0x120] sm:$0xff]  ;;  %v314_v56 = vld [vmem:[#allocation7 + $0x108] sm:$0xff]  ;;  %v1769_v61 = vld [vmem:[#allocation10 + $0x78] sm:$0xff] }
  0x46   :  { %1304 = vmatpush3.msra.mxu1 %v107_v23  ;;  %1267 = vmatprep.subr.mxu0 %v127_v25  ;;  %v313_v57 = vld [vmem:[#allocation7 + $0x100] sm:$0xff]  ;;  %v309_v58 = vld [vmem:[#allocation2 + $0xa] sm:$0xff]  ;;  %v1785_v2 = vld [vmem:[#allocation10 + $0x58] sm:$0xff] }
  0x47   :  { %1305 = vmatprep.subr.mxu1 %v106_v26  ;;  %1268 = vmatpush3.msra.mxu0 %v127_v25  ;;  %v310_v59 = vld [vmem:[#allocation2 + $0x1a] sm:$0xff]  ;;  %v311_v60 = vld [vmem:[#allocation2 + $0x22] sm:$0xff]  ;;  %v1771_v62 = vld [vmem:[#allocation10 + $0x70] sm:$0xff] }
  0x48   :  { %1306 = vmatpush3.msra.mxu1 %v106_v26  ;;  %1269 = vmatprep.subr.mxu0 %v126_v27  ;;  %v1777_v63 = vld [vmem:[#allocation10 + $0x68] sm:$0xff]  ;;  %v1781_v1 = vld [vmem:[#allocation10 + $0x60] sm:$0xff]  ;;  %v1789_v3 = vld [vmem:[#allocation10 + $0x50] sm:$0xff] }
  0x49   :  { %1307 = vmatprep.subr.mxu1 %v105_v28  ;;  %1270 = vmatpush3.msra.mxu0 %v126_v27  ;;  %v1793_v4 = vld [vmem:[#allocation10 + $0x48] sm:$0xff]  ;;  %v1797_v5 = vld [vmem:[#allocation10 + $0x40] sm:$0xff]  ;;  %v1801_v6 = vld [vmem:[#allocation10 + $0x38] sm:$0xff] }
  0x4a   :  { %1308 = vmatpush3.msra.mxu1 %v105_v28  ;;  %1271 = vmatprep.subr.mxu0 %v125_v29  ;;  %v1805_v7 = vld [vmem:[#allocation10 + $0x30] sm:$0xff]  ;;  %v1809_v8 = vld [vmem:[#allocation10 + $0x28] sm:$0xff]  ;;  %v1813_v9 = vld [vmem:[#allocation10 + $0x20] sm:$0xff] }
  0x4b   :  { %1309 = vmatprep.subr.mxu1 %v104_v30  ;;  %1272 = vmatpush3.msra.mxu0 %v125_v29  ;;  %v1816_v10 = vld [vmem:[#allocation10 + $0x18] sm:$0xff]  ;;  %v1819_v11 = vld [vmem:[#allocation10 + $0x10] sm:$0xff]  ;;  %v1825_v12 = vld [vmem:[#allocation10 + $0x8] sm:$0xff] }
  0x4c   :  { %1310 = vmatpush3.msra.mxu1 %v104_v30  ;;  %1273 = vmatprep.subr.mxu0 %v124_v31  ;;  %v1829_v13 = vld [vmem:[#allocation10] sm:$0xff] }
  0x4d   :  { %1311 = vmatprep.subr.mxu1 %v103_v32  ;;  %1274 = vmatpush3.msra.mxu0 %v124_v31 }
  0x4e   :  { %1312 = vmatpush3.msra.mxu1 %v103_v32  ;;  %1275 = vmatprep.subr.mxu0 %v123_v33 }
  0x4f   :  { %1313 = vmatprep.subr.mxu1 %v102_v34  ;;  %1276 = vmatpush3.msra.mxu0 %v123_v33 }
  0x50   :  { %1314 = vmatpush3.msra.mxu1 %v102_v34  ;;  %1277 = vmatprep.subr.mxu0 %v122_v35 }
  0x51   :  { %1315 = vmatprep.subr.mxu1 %v101_v36  ;;  %1278 = vmatpush3.msra.mxu0 %v122_v35 }
  0x52   :  { %1279 = vmatprep.mubr.f32.mxu0 %v1756_v15  ;;  %1316 = vmatpush3.msra.mxu1 %v101_v36 }
  0x53   :  { %1317 = vmatprep.mubr.f32.mxu1 %v97_v37  ;;  %1280 = vmatmul.mubr.f32.vlgmr.msra.gmra.mxu0 %v1759_v16 }
  0x54   :  { %1318 = vmatmul.mubr.f32.vlgmr.msra.gmra.mxu1 %v98_v38  ;;  %1323 = vmatprep.subr.mxu0 %v328_v39 }
  0x55   :  { %1282 = vmatprep.mubr.f32.mxu0 %v91_v21  ;;  %1324 = vmatpush3.msra.mxu0 %v328_v39 }
  0x56   :  { %1320 = vmatprep.mubr.f32.mxu1 %v99_v40  ;;  %1325 = vmatprep.subr.mxu0 %v327_v41 }
  0x57   :  { %1361 = vmatprep.subr.mxu1 %v1676_v0  ;;  %1326 = vmatpush3.msra.mxu0 %v327_v41 }
  0x58   :  { %1321 = vmatmul.mubr.f32.gmra.mxu1 %v100_v42  ;;  %1327 = vmatprep.subr.mxu0 %v326_v43 }
  0x59   :  { %1283 = vmatmul.mubr.f32.gmra.mxu0 %v1762_v24  ;;  %1362 = vmatpush3.msra.mxu1 %v1769_v61 }
  0x5a   :  { %1328 = vmatpush3.msra.mxu0 %v326_v43  ;;  %1355 = vmatprep.mubr.f32.mxu0 %v308_v44 }
  0x5b   :  { %1329 = vmatprep.subr.mxu0 %v325_v45  ;;  %1363 = vmatprep.subr.mxu1 %v1676_v0 }
  0x5c   :  { %1330 = vmatpush3.msra.mxu0 %v325_v45  ;;  %1364 = vmatpush3.msra.mxu1 %v1771_v62 }
  0x5d   :  { %1331 = vmatprep.subr.mxu0 %v324_v46  ;;  %1365 = vmatprep.subr.mxu1 %v1676_v0 }
  0x5e   :  { %1332 = vmatpush3.msra.mxu0 %v324_v46  ;;  %1366 = vmatpush3.msra.mxu1 %v1777_v63 }
  0x5f   :  { %1333 = vmatprep.subr.mxu0 %v323_v47  ;;  %1367 = vmatprep.subr.mxu1 %v1676_v0 }
  0x60   :  { %1334 = vmatpush3.msra.mxu0 %v323_v47  ;;  %1368 = vmatpush3.msra.mxu1 %v1781_v1 }
  0x61   :  { %1335 = vmatprep.subr.mxu0 %v322_v48  ;;  %1369 = vmatprep.subr.mxu1 %v1676_v0 }
  0x62   :  { %1336 = vmatpush3.msra.mxu0 %v322_v48  ;;  %1370 = vmatpush3.msra.mxu1 %v1785_v2 }
  0x63   :  { %1337 = vmatprep.subr.mxu0 %v321_v49  ;;  %1371 = vmatprep.subr.mxu1 %v1676_v0 }
  0x64   :  { %1338 = vmatpush3.msra.mxu0 %v321_v49  ;;  %1372 = vmatpush3.msra.mxu1 %v1789_v3 }
  0x65   :  { %1339 = vmatprep.subr.mxu0 %v320_v50  ;;  %1373 = vmatprep.subr.mxu1 %v1676_v0 }
  0x66   :  { %1340 = vmatpush3.msra.mxu0 %v320_v50  ;;  %1374 = vmatpush3.msra.mxu1 %v1793_v4 }
  0x67   :  { %1341 = vmatprep.subr.mxu0 %v319_v51  ;;  %1375 = vmatprep.subr.mxu1 %v1676_v0 }
  0x68   :  { %1342 = vmatpush3.msra.mxu0 %v319_v51  ;;  %1376 = vmatpush3.msra.mxu1 %v1797_v5 }
  0x69   :  { %1343 = vmatprep.subr.mxu0 %v318_v52  ;;  %1377 = vmatprep.subr.mxu1 %v1676_v0 }
  0x6a   :  { %1344 = vmatpush3.msra.mxu0 %v318_v52  ;;  %1378 = vmatpush3.msra.mxu1 %v1801_v6 }
  0x6b   :  { %1345 = vmatprep.subr.mxu0 %v317_v53  ;;  %1379 = vmatprep.subr.mxu1 %v1676_v0 }
  0x6c   :  { %1346 = vmatpush3.msra.mxu0 %v317_v53  ;;  %1380 = vmatpush3.msra.mxu1 %v1805_v7 }
  0x6d   :  { %1347 = vmatprep.subr.mxu0 %v316_v54  ;;  %1381 = vmatprep.subr.mxu1 %v1676_v0 }
  0x6e   :  { %1348 = vmatpush3.msra.mxu0 %v316_v54  ;;  %1382 = vmatpush3.msra.mxu1 %v1809_v8 }
  0x6f   :  { %1349 = vmatprep.subr.mxu0 %v315_v55  ;;  %1383 = vmatprep.subr.mxu1 %v1676_v0 }
  0x70   :  { %1350 = vmatpush3.msra.mxu0 %v315_v55  ;;  %1384 = vmatpush3.msra.mxu1 %v1813_v9 }
  0x71   :  { %1351 = vmatprep.subr.mxu0 %v314_v56  ;;  %1385 = vmatprep.subr.mxu1 %v1676_v0 }
  0x72   :  { %1352 = vmatpush3.msra.mxu0 %v314_v56  ;;  %1393 = vmatprep.mubr.msk.f32.mxu1 %vm1677_vm0, %v1676_v0 }
  0x73   :  { %1353 = vmatprep.subr.mxu0 %v313_v57  ;;  %1386 = vmatpush3.msra.mxu1 %v1816_v10 }
  0x74   :  { %1354 = vmatpush3.msra.mxu0 %v313_v57  ;;  %1387 = vmatprep.subr.mxu1 %v1676_v0  ;;  %v622_v57 = vld [vmem:[#allocation9 + $0xf8] sm:$0xff] }
  0x75   :  { %1356 = vmatmul.mubr.f32.vlgmr.msra.gmra.mxu0 %v309_v58  ;;  %1388 = vmatpush3.msra.mxu1 %v1819_v11  ;;  %v621_v58 = vld [vmem:[#allocation9 + $0xf0] sm:$0xff] }
  0x76   :  { %1358 = vmatprep.mubr.f32.mxu0 %v310_v59  ;;  %1389 = vmatprep.subr.mxu1 %v1676_v0  ;;  %v620_v59 = vld [vmem:[#allocation9 + $0xe8] sm:$0xff] }
  0x77   :  { %1390 = vmatpush3.msra.mxu1 %v1825_v12  ;;  %1396 = vmatprep.subr.mxu0 %v622_v57 }
  0x78   :  { %1391 = vmatprep.subr.mxu1 %v1676_v0  ;;  %1397 = vmatpush3.msra.mxu0 %v622_v57 }
  0x79   :  { %1359 = vmatmul.mubr.f32.gmra.mxu0 %v311_v60  ;;  %1392 = vmatpush3.msra.mxu1 %v1829_v13  ;;  %v619_v60 = vld [vmem:[#allocation9 + $0xe0] sm:$0xff] }
  0x7a   :  { %1398 = vmatprep.subr.mxu0 %v621_v58 }
  0x7b   :  { %1399 = vmatpush3.msra.mxu0 %v621_v58 }
  0x7c   :  { %1400 = vmatprep.subr.mxu0 %v620_v59 }
  0x7d   :  { %1401 = vmatpush3.msra.mxu0 %v620_v59 }
  0x7e   :  { %1402 = vmatprep.subr.mxu0 %v619_v60 }
  0x7f   :  { %1403 = vmatpush3.msra.mxu0 %v619_v60 }
 0x113   :  { %v1281_v14 = vpop.f32.mrf.mxu0 }
 0x114   :  { %v1319_v15 = vpop.f32.mrf.mxu1 }
 0x115   :  { %v204_v16 = vpop.f32.mrf.mxu0  ;;  %v295_v22 = vadd.f32 %v1319_v15, %v1281_v14  ;;  %v618_v14 = vld [vmem:[#allocation9 + $0xd8] sm:$0xff] }
 0x116   :  { %v289_v18 = vpop.f32.mrf.mxu1  ;;  %v601_v15 = vld [vmem:[#allocation9 + $0x78] sm:$0xff]  ;;  %1404 = vmatprep.subr.mxu0 %v618_v14 }
 0x117   :  { %v290_v23 = vadd.f32 %v289_v18, %v204_v16  ;;  %1434 = vmatprep.subr.mxu1 %v601_v15  ;;  %1405 = vmatpush3.msra.mxu0 %v618_v14  ;;  %v617_v16 = vld [vmem:[#allocation9 + $0xd0] sm:$0xff]  ;;  %v616_v18 = vld [vmem:[#allocation9 + $0xc8] sm:$0xff] }
 0x118   :  { %v1322_v19 = vpop.f32.mrf.mxu1  ;;  %1406 = vmatprep.subr.mxu0 %v617_v16 }
 0x119   :  { %v1284_v17 = vpop.f32.mrf.mxu0  ;;  %1407 = vmatpush3.msra.mxu0 %v617_v16 }
 0x11a   :  { %v299_v24 = vpop.f32.mrf.mxu1  ;;  %v305_v29 = vadd.f32 %v1322_v19, %v1284_v17  ;;  %v600_v17 = vld [vmem:[#allocation9 + $0x70] sm:$0xff]  ;;  %v599_v19 = vld [vmem:[#allocation9 + $0x68] sm:$0xff]  ;;  %1408 = vmatprep.subr.mxu0 %v616_v18 }
 0x11b   :  { %v214_v20 = vpop.f32.mrf.mxu0  ;;  %1409 = vmatpush3.msra.mxu0 %v616_v18 }
 0x11c   :  { %v300_v30 = vadd.f32 %v299_v24, %v214_v20  ;;  %v615_v20 = vld [vmem:[#allocation9 + $0xc0] sm:$0xff]  ;;  %v613_v24 = vld [vmem:[#allocation9 + $0xb0] sm:$0xff] }
 0x11d   :  { %1410 = vmatprep.subr.mxu0 %v615_v20 }
 0x11e   :  { %1411 = vmatpush3.msra.mxu0 %v615_v20 }
 0x135   :  { %v1357_v21 = vpop.f32.mrf.mxu0 }
 0x136   :  { %v1834_v26 = vadd.f32 %v1357_v21, %v295_v22  ;;  %v598_v21 = vld [vmem:[#allocation9 + $0x60] sm:$0xff]  ;;  %v614_v22 = vld [vmem:[#allocation9 + $0xb8] sm:$0xff] }
 0x137   :  { %v395_v25 = vpop.f32.mrf.mxu0  ;;  %1412 = vmatprep.subr.mxu0 %v614_v22 }
 0x138   :  { %v1836_v27 = vadd.f32 %v395_v25, %v290_v23  ;;  %v428_v33 = vmul.f32 %v1834_v26, %v1834_v26  ;;  %v597_v23 = vld [vmem:[#allocation9 + $0x58] sm:$0xff]  ;;  %1413 = vmatpush3.msra.mxu0 %v614_v22  ;;  %v596_v25 = vld [vmem:[#allocation9 + $0x50] sm:$0xff] }
 0x139   :  { %v1360_v28 = vpop.f32.mrf.mxu0  ;;  %1414 = vmatprep.subr.mxu0 %v613_v24 }
 0x13a   :  { %v427_v31 = vmul.f32 %v1836_v27, %v1836_v27  ;;  %v418_v34 = vadd.f32 %v1834_v26, %v1836_v27  ;;  %v1844_v35 = vadd.f32 %v1360_v28, %v305_v29  ;;  %1415 = vmatpush3.msra.mxu0 %v613_v24  ;;  %v612_v28 = vld [vmem:[#allocation9 + $0xa8] sm:$0xff] }
 0x13b   :  { %v405_v32 = vpop.f32.mrf.mxu0  ;;  %v595_v29 = vld [vmem:[#allocation9 + $0x48] sm:$0xff]  ;;  %1416 = vmatprep.subr.mxu0 %v612_v28 }
 0x13c   :  { %v1846_v36 = vadd.f32 %v405_v32, %v300_v30  ;;  %v431_v37 = vadd.f32 %v428_v33, %v427_v31  ;;  %v430_v40 = vmul.f32 %v1844_v35, %v1844_v35  ;;  %1417 = vmatpush3.msra.mxu0 %v612_v28  ;;  %v611_v30 = vld [vmem:[#allocation9 + $0xa0] sm:$0xff]  ;;  %v610_v32 = vld [vmem:[#allocation9 + $0x98] sm:$0xff] }
 0x13d   :  { %v594_v31 = vld [vmem:[#allocation9 + $0x40] sm:$0xff]  ;;  %1418 = vmatprep.subr.mxu0 %v611_v30  ;;  %v593_v33 = vld [vmem:[#allocation9 + $0x38] sm:$0xff] }
 0x13e   :  { %v419_v38 = vadd.f32 %v418_v34, %v1846_v36  ;;  %v429_v39 = vmul.f32 %v1846_v36, %v1846_v36  ;;  %1419 = vmatpush3.msra.mxu0 %v611_v30  ;;  %v609_v34 = vld [vmem:[#allocation9 + $0x90] sm:$0xff] }
 0x13f   :  { %1420 = vmatprep.subr.mxu0 %v610_v32 }
 0x140   :  { %v420_v41 = vadd.f32 %v419_v38, %v1844_v35  ;;  %v432_v42 = vadd.f32 %v431_v37, %v429_v39  ;;  %1421 = vmatpush3.msra.mxu0 %v610_v32  ;;  %v592_v37 = vld [vmem:[#allocation9 + $0x30] sm:$0xff]  ;;  %v608_v38 = vld [vmem:[#allocation9 + $0x88] sm:$0xff]  ;;  %v810_v32 = vld [vmem:[#allocation9 + $0x160] sm:$0xff] }
 0x141   :  { %1422 = vmatprep.subr.mxu0 %v609_v34  ;;  %v591_v39 = vld [vmem:[#allocation9 + $0x28] sm:$0xff] }
 0x142   :  { %v421_v43 = vrot.slane %v420_v41, 4  ;;  %v433_v44 = vadd.f32 %v432_v42, %v430_v40  ;;  %1423 = vmatpush3.msra.mxu0 %v609_v34  ;;  %v607_v40 = vld [vmem:[#allocation9 + $0x80] sm:$0xff]  ;;  %v589_v42 = vld [vmem:[#allocation9 + $0x18] sm:$0xff] }
 0x143   :  { %1424 = vmatprep.subr.mxu0 %v608_v38 }
 0x144   :  { %v422_v45 = vadd.f32 %v421_v43, %v420_v41  ;;  %v434_v46 = vrot.slane %v433_v44, 4  ;;  %1425 = vmatpush3.msra.mxu0 %v608_v38  ;;  %v590_v41 = vld [vmem:[#allocation9 + $0x20] sm:$0xff]  ;;  %v588_v43 = vld [vmem:[#allocation9 + $0x10] sm:$0xff] }
 0x145   :  { %1426 = vmatprep.subr.mxu0 %v607_v40 }
 0x146   :  { %v423_v47 = vrot.slane %v422_v45, 2  ;;  %v435_v48 = vadd.f32 %v434_v46, %v433_v44  ;;  %1427 = vmatpush3.msra.mxu0 %v607_v40  ;;  %v813_v44 = vld [vmem:[#allocation9 + $0x178] sm:$0xff]  ;;  %v586_v46 = vld [vmem:[#allocation9] sm:$0xff]  ;;  %v808_v40 = vld [vmem:[#allocation9 + $0x150] sm:$0xff] }
 0x147   :  { %1472 = vmatprep.subr.mxu0 %v813_v44 }
 0x148   :  { %v424_v49 = vadd.f32 %v423_v47, %v422_v45  ;;  %v436_v50 = vrot.slane %v435_v48, 2  ;;  %v587_v45 = vld [vmem:[#allocation9 + $0x8] sm:$0xff] }
 0x14a   :  { %v425_v51 = vrot.slane %v424_v49, 1  ;;  %v437_v52 = vadd.f32 %v436_v50, %v435_v48 }
 0x14c   :  { %v438_v53 = vrot.slane %v437_v52, 1  ;;  %v426_v54 = vadd.f32 %v425_v51, %v424_v49 }
 0x14e   :  { %v439_v55 = vadd.f32 %v438_v53, %v437_v52  ;;  %v543_v53 = vlaneseq }
 0x150   :  { %v441_v56 = vsel %vm440_vm1, %v426_v54, %v439_v55  ;;  %v1856_v54 = vshrl.u32 %v543_v53, 7 }
 0x151   :  { %1394 = vmatmul.mubr.f32.vlgmr.msra.gmra.mxu1 %v441_v56  ;;  %v1089_v56 = vld [vmem:[%s1928_s4] ss:$0 sm:$0xff] }
 0x152   :  { %1435 = vmatpush3.msra.mxu1 %v601_v15  ;;  %v545_v55 = vsub.s32 0, %v1856_v54  ;;  %v553_v58 = vsub.s32 1, %v1856_v54  ;;  %v1560_v54 = vld [vmem:[#allocation2 + $0x19] sm:$0xff] }
 0x153   :  { %1436 = vmatprep.subr.mxu1 %v600_v17 }
 0x154   :  { %1437 = vmatpush3.msra.mxu1 %v600_v17 }
 0x155   :  { %1438 = vmatprep.subr.mxu1 %v599_v19 }
 0x156   :  { %1439 = vmatpush3.msra.mxu1 %v599_v19  ;;  %v1090_v19 = vld [vmem:[%s1929_s5] ss:$0 sm:$0xff] }
 0x157   :  { %1440 = vmatprep.subr.mxu1 %v598_v21 }
 0x158   :  { %1441 = vmatpush3.msra.mxu1 %v598_v21 }
 0x159   :  { %1442 = vmatprep.subr.mxu1 %v597_v23 }
 0x15a   :  { %1443 = vmatpush3.msra.mxu1 %v597_v23 }
 0x15b   :  { %1444 = vmatprep.subr.mxu1 %v596_v25 }
 0x15c   :  { %1445 = vmatpush3.msra.mxu1 %v596_v25 }
 0x15d   :  { %1446 = vmatprep.subr.mxu1 %v595_v29 }
 0x15e   :  { %1447 = vmatpush3.msra.mxu1 %v595_v29 }
 0x15f   :  { %1448 = vmatprep.subr.mxu1 %v594_v31 }
 0x160   :  { %1449 = vmatpush3.msra.mxu1 %v594_v31  ;;  %v811_v31 = vld [vmem:[#allocation9 + $0x168] sm:$0xff] }
 0x161   :  { %1450 = vmatprep.subr.mxu1 %v593_v33 }
 0x162   :  { %1451 = vmatpush3.msra.mxu1 %v593_v33 }
 0x163   :  { %1452 = vmatprep.subr.mxu1 %v592_v37 }
 0x164   :  { %1453 = vmatpush3.msra.mxu1 %v592_v37  ;;  %v809_v37 = vld [vmem:[#allocation9 + $0x158] sm:$0xff] }
 0x165   :  { %1454 = vmatprep.subr.mxu1 %v591_v39 }
 0x166   :  { %1455 = vmatpush3.msra.mxu1 %v591_v39 }
 0x167   :  { %1456 = vmatprep.subr.mxu1 %v590_v41 }
 0x168   :  { %1457 = vmatpush3.msra.mxu1 %v590_v41  ;;  %v807_v41 = vld [vmem:[#allocation9 + $0x148] sm:$0xff] }
 0x169   :  { %1458 = vmatprep.subr.mxu1 %v589_v42 }
 0x16a   :  { %1459 = vmatpush3.msra.mxu1 %v589_v42 }
 0x16b   :  { %1460 = vmatprep.subr.mxu1 %v588_v43 }
 0x16c   :  { %1461 = vmatpush3.msra.mxu1 %v588_v43  ;;  %v806_v43 = vld [vmem:[#allocation9 + $0x140] sm:$0xff] }
 0x16d   :  { %1462 = vmatprep.subr.mxu1 %v587_v45 }
 0x16e   :  { %1463 = vmatpush3.msra.mxu1 %v587_v45  ;;  %v804_v45 = vld [vmem:[#allocation9 + $0x130] sm:$0xff] }
 0x16f   :  { %1464 = vmatprep.subr.mxu1 %v586_v46 }
 0x170   :  { %1465 = vmatpush3.msra.mxu1 %v586_v46 }
 0x171   :  { %1510 = vmatprep.subr.mxu1 %v1676_v0 }
 0x211   :  { %v524_v47 = vpop.f32.mrf.mxu1 }
 0x212   :  { %v528_v48 = vmul.f32 %v524_v47, %v524_v47  ;;  %v546_v57 = vrot.slane %v524_v47, %v545_v55 }
 0x213   :  { %v1395_v49 = vpop.f32.mrf.mxu1 }
 0x214   :  { %v530_v50 = vrot.slane %v528_v48, 7  ;;  %v547_v14 = vsub.f32 %v1836_v27, %v546_v57  ;;  %v548_v15 = vsub.f32 %v1834_v26, %v546_v57  ;;  %v549_v16 = vsub.f32 %v1846_v36, %v546_v57 }
 0x215   :  { %v550_v17 = vsub.f32 %v1844_v35, %v546_v57  ;;  %v812_v35 = vld [vmem:[#allocation9 + $0x170] sm:$0xff] }
 0x216   :  { %v532_v51 = vsub.f32 %v524_v47, %v530_v50 }
 0x218   :  { %v533_v52 = vadd.f32 1e-05, %v532_v51 }
 0x21a   :  { %1554 = vrsqrt.f32 %v533_v52 }
 0x227   :  { %v1555_v59 = vpop.eup %1554 }
 0x228   :  { %v542_v60 = vmul.f32 %v1555_v59, %v1089_v56 }
 0x22a   :  { %v554_v18 = vrot.slane %v542_v60, %v553_v58 }
 0x22c   :  { %v555_v20 = vmul.f32 %v554_v18, %v547_v14  ;;  %v556_v21 = vmul.f32 %v554_v18, %v548_v15  ;;  %v557_v22 = vmul.f32 %v554_v18, %v549_v16  ;;  %v558_v23 = vmul.f32 %v554_v18, %v550_v17 }
 0x22e   :  { %v566_v24 = vadd.f32 %v1090_v19, %v555_v20  ;;  %v567_v25 = vadd.f32 %v1090_v19, %v556_v21  ;;  %v568_v27 = vadd.f32 %v1090_v19, %v557_v22  ;;  %v569_v28 = vadd.f32 %v1090_v19, %v558_v23 }
 0x230   :  { %v570_v26 = vmax.f32 %v566_v24, 0.0  ;;  %v571_v29 = vmax.f32 %v567_v25, 0.0  ;;  %v572_v36 = vmax.f32 %v568_v27, 0.0  ;;  %v573_v30 = vmax.f32 %v569_v28, 0.0 }
 0x232   :  { %578 = vst [vmem:[#allocation3 + $0x1] sm:$0xff] %v570_v26  ;;  %579 = vst [vmem:[#allocation3 + $0x9] sm:$0xff] %v571_v29  ;;  %1428 = vmatprep.mubr.f32.mxu0 %v570_v26 }
 0x233   :  { %580 = vst [vmem:[#allocation3 + $0x19] sm:$0xff] %v572_v36  ;;  %581 = vst [vmem:[#allocation3 + $0x21] sm:$0xff] %v573_v30  ;;  %1429 = vmatmul.mubr.f32.vlgmr.msra.gmra.mxu0 %v571_v29 }
 0x234   :  { %1473 = vmatpush3.msra.mxu0 %v813_v44  ;;  %1431 = vmatprep.mubr.f32.mxu0 %v572_v36  ;;  %v805_v44 = vld [vmem:[#allocation9 + $0x138] sm:$0xff] }
 0x235   :  { %1474 = vmatprep.subr.mxu0 %v812_v35 }
 0x236   :  { %1475 = vmatpush3.msra.mxu0 %v812_v35 }
 0x237   :  { %1476 = vmatprep.subr.mxu0 %v811_v31  ;;  %1432 = vmatmul.mubr.f32.gmra.mxu0 %v573_v30 }
 0x238   :  { %1477 = vmatpush3.msra.mxu0 %v811_v31 }
 0x239   :  { %v582_v33 = vld [vmem:[#allocation3] sm:$0xff]  ;;  %v583_v34 = vld [vmem:[#allocation3 + $0x8] sm:$0xff]  ;;  %1478 = vmatprep.subr.mxu0 %v810_v32 }
 0x23a   :  { %1466 = vmatprep.mubr.f32.mxu1 %v582_v33  ;;  %v793_v38 = vld [vmem:[#allocation3 + $0x2] sm:$0xff]  ;;  %1479 = vmatpush3.msra.mxu0 %v810_v32  ;;  %v584_v39 = vld [vmem:[#allocation3 + $0x18] sm:$0xff] }
 0x23b   :  { %1467 = vmatmul.mubr.f32.vlgmr.msra.gmra.mxu1 %v583_v34  ;;  %1504 = vmatprep.mubr.f32.mxu0 %v793_v38  ;;  %v585_v42 = vld [vmem:[#allocation3 + $0x20] sm:$0xff] }
 0x23c   :  { %1469 = vmatprep.mubr.f32.mxu1 %v584_v39  ;;  %1480 = vmatprep.subr.mxu0 %v809_v37 }
 0x23d   :  { %1481 = vmatpush3.msra.mxu0 %v809_v37  ;;  %1511 = vmatpush3.msra.mxu1 %v1769_v61  ;;  %v803_v61 = vld [vmem:[#allocation9 + $0x128] sm:$0xff] }
 0x23e   :  { %1482 = vmatprep.subr.mxu0 %v808_v40  ;;  %1512 = vmatprep.subr.mxu1 %v1676_v0 }
 0x23f   :  { %1470 = vmatmul.mubr.f32.gmra.mxu1 %v585_v42  ;;  %1483 = vmatpush3.msra.mxu0 %v808_v40 }
 0x240   :  { %1484 = vmatprep.subr.mxu0 %v807_v41  ;;  %1513 = vmatpush3.msra.mxu1 %v1771_v62  ;;  %v802_v62 = vld [vmem:[#allocation9 + $0x120] sm:$0xff] }
 0x241   :  { %1485 = vmatpush3.msra.mxu0 %v807_v41  ;;  %1514 = vmatprep.subr.mxu1 %v1676_v0 }
 0x242   :  { %1486 = vmatprep.subr.mxu0 %v806_v43  ;;  %1515 = vmatpush3.msra.mxu1 %v1777_v63  ;;  %v801_v63 = vld [vmem:[#allocation9 + $0x118] sm:$0xff] }
 0x243   :  { %1487 = vmatpush3.msra.mxu0 %v806_v43  ;;  %1516 = vmatprep.subr.mxu1 %v1676_v0  ;;  %v1091_v43 = vld [vmem:[%s1930_s6] ss:$0 sm:$0xff]  ;;  %s1678_s6 = smov [#allocation12]  }
 0x244   :  { %1488 = vmatprep.subr.mxu0 %v805_v44  ;;  %1517 = vmatpush3.msra.mxu1 %v1781_v1  ;;  %v800_v1 = vld [vmem:[#allocation9 + $0x110] sm:$0xff]  ;;  %s1075_s29 = sshll.u32 %s1678_s6, 4  ;;  %s1076_s29 = int_to_ptr.vmem [resolvable:$true] %s1075_s29 }
 0x245   :  { %1489 = vmatpush3.msra.mxu0 %v805_v44  ;;  %1518 = vmatprep.subr.mxu1 %v1676_v0  ;;  %p1647_p7 = scmp.lt.s32.totalorder %s1076_s29, %s1076_s29 }
 0x246   :  { %1490 = vmatprep.subr.mxu0 %v804_v45  ;;  %1519 = vmatpush3.msra.mxu1 %v1785_v2  ;;  %v799_v2 = vld [vmem:[#allocation9 + $0x108] sm:$0xff] }
 0x247   :  { %1491 = vmatpush3.msra.mxu0 %v804_v45  ;;  %1520 = vmatprep.subr.mxu1 %v1676_v0 }
 0x248   :  { %1492 = vmatprep.subr.mxu0 %v803_v61  ;;  %1521 = vmatpush3.msra.mxu1 %v1789_v3  ;;  %v798_v3 = vld [vmem:[#allocation9 + $0x100] sm:$0xff] }
 0x249   :  { %1493 = vmatpush3.msra.mxu0 %v803_v61  ;;  %1522 = vmatprep.subr.mxu1 %v1676_v0 }
 0x24a   :  { %1494 = vmatprep.subr.mxu0 %v802_v62  ;;  %1523 = vmatpush3.msra.mxu1 %v1793_v4  ;;  %v794_v4 = vld [vmem:[#allocation3 + $0xa] sm:$0xff] }
 0x24b   :  { %1495 = vmatpush3.msra.mxu0 %v802_v62  ;;  %1524 = vmatprep.subr.mxu1 %v1676_v0 }
 0x24c   :  { %1496 = vmatprep.subr.mxu0 %v801_v63  ;;  %1525 = vmatpush3.msra.mxu1 %v1797_v5  ;;  %v795_v5 = vld [vmem:[#allocation3 + $0x1a] sm:$0xff] }
 0x24d   :  { %1497 = vmatpush3.msra.mxu0 %v801_v63  ;;  %1526 = vmatprep.subr.mxu1 %v1676_v0 }
 0x24e   :  { %1498 = vmatprep.subr.mxu0 %v800_v1  ;;  %1527 = vmatpush3.msra.mxu1 %v1801_v6  ;;  %v796_v6 = vld [vmem:[#allocation3 + $0x22] sm:$0xff] }
 0x24f   :  { %1499 = vmatpush3.msra.mxu0 %v800_v1  ;;  %1528 = vmatprep.subr.mxu1 %v1676_v0 }
 0x250   :  { %1500 = vmatprep.subr.mxu0 %v799_v2  ;;  %1529 = vmatpush3.msra.mxu1 %v1805_v7 }
 0x251   :  { %1501 = vmatpush3.msra.mxu0 %v799_v2  ;;  %1530 = vmatprep.subr.mxu1 %v1676_v0 }
 0x252   :  { %1502 = vmatprep.subr.mxu0 %v798_v3  ;;  %1531 = vmatpush3.msra.mxu1 %v1809_v8 }
 0x253   :  { %1503 = vmatpush3.msra.mxu0 %v798_v3  ;;  %1532 = vmatprep.subr.mxu1 %v1676_v0 }
 0x254   :  { %1505 = vmatmul.mubr.f32.vlgmr.msra.gmra.mxu0 %v794_v4  ;;  %1533 = vmatpush3.msra.mxu1 %v1813_v9  ;;  %v1092_v4 = vld [vmem:[%s1931_s7] ss:$0 sm:$0xff]  ;;  %s1642_s7 = scalar_lea.vmem %s1076_s29, 512 }
 0x255   :  { %1507 = vmatprep.mubr.f32.mxu0 %v795_v5  ;;  %1534 = vmatprep.subr.mxu1 %v1676_v0  ;;  %p1643_p6 = scmp.ne.s32.totalorder %s1076_s29, %s1642_s7  ;;  %p1648_p8 = scmp.lt.s32.totalorder %s1642_s7, %s1642_s7 }
 0x256   :  { %1535 = vmatpush3.msra.mxu1 %v1816_v10  ;;  %1542 = vmatprep.mubr.msk.f32.mxu1 %vm1677_vm0, %v1676_v0 }
 0x257   :  { %1536 = vmatprep.subr.mxu1 %v1676_v0  ;;  %p1649_p9 = por %p1648_p8, %p1647_p7 }
 0x258   :  { %1508 = vmatmul.mubr.f32.gmra.mxu0 %v796_v6  ;;  %1537 = vmatpush3.msra.mxu1 %v1819_v11 }
 0x259   :  { %1538 = vmatprep.subr.mxu1 %v1676_v0  ;;  %p1650_p10 = pnand %p1649_p9, %p1643_p6 }
 0x25a   :  { %1539 = vmatpush3.msra.mxu1 %v1825_v12 }
 0x25b   :  { %1540 = vmatprep.subr.mxu1 %v1676_v0 }
 0x25c   :  { %1541 = vmatpush3.msra.mxu1 %v1829_v13 }
 0x2f3   :  { %v1430_v7 = vpop.f32.mrf.mxu0 }
 0x2f5   :  { %v689_v9 = vpop.f32.mrf.mxu0 }
 0x2f7   :  { %v1433_v46 = vpop.f32.mrf.mxu0 }
 0x2f9   :  { %v699_v48 = vpop.f32.mrf.mxu0 }
 0x2fb   :  { %v1468_v8 = vpop.f32.mrf.mxu1 }
 0x2fc   :  { %v780_v50 = vadd.f32 %v1468_v8, %v1430_v7 }
 0x2fd   :  { %v774_v10 = vpop.f32.mrf.mxu1 }
 0x2fe   :  { %v775_v51 = vadd.f32 %v774_v10, %v689_v9 }
 0x2ff   :  { %v1471_v47 = vpop.f32.mrf.mxu1 }
 0x300   :  { %v790_v12 = vadd.f32 %v1471_v47, %v1433_v46  ;;  %v1558_v47 = vld [vmem:[#allocation2 + $0x1] sm:$0xff] }
 0x301   :  { %v784_v52 = vpop.f32.mrf.mxu1 }
 0x302   :  { %v785_v59 = vadd.f32 %v784_v52, %v699_v48 }
 0x314   :  { %v1506_v49 = vpop.f32.mrf.mxu0 }
 0x315   :  { %v900_v53 = vadd.f32 %v1506_v49, %v780_v50  ;;  %v1559_v49 = vld [vmem:[#allocation2 + $0x9] sm:$0xff] }
 0x316   :  { %v880_v11 = vpop.f32.mrf.mxu0 }
 0x317   :  { %v899_v56 = vadd.f32 %v880_v11, %v775_v51  ;;  %v913_v13 = vmul.f32 %v900_v53, %v900_v53  ;;  %v1561_v51 = vld [vmem:[#allocation2 + $0x21] sm:$0xff] }
 0x318   :  { %v1509_v57 = vpop.f32.mrf.mxu0 }
 0x319   :  { %v912_v0 = vmul.f32 %v899_v56, %v899_v56  ;;  %v903_v14 = vadd.f32 %v900_v53, %v899_v56  ;;  %v902_v15 = vadd.f32 %v1509_v57, %v790_v12 }
 0x31a   :  { %v890_v60 = vpop.f32.mrf.mxu0 }
 0x31b   :  { %v901_v16 = vadd.f32 %v890_v60, %v785_v59  ;;  %v916_v17 = vadd.f32 %v913_v13, %v912_v0  ;;  %v915_v20 = vmul.f32 %v902_v15, %v902_v15 }
 0x31d   :  { %v904_v18 = vadd.f32 %v903_v14, %v901_v16  ;;  %v914_v19 = vmul.f32 %v901_v16, %v901_v16 }
 0x31f   :  { %v905_v21 = vadd.f32 %v904_v18, %v902_v15  ;;  %v917_v22 = vadd.f32 %v916_v17, %v914_v19 }
 0x321   :  { %v906_v23 = vrot.slane %v905_v21, 4  ;;  %v918_v24 = vadd.f32 %v917_v22, %v915_v20 }
 0x323   :  { %v907_v25 = vadd.f32 %v906_v23, %v905_v21  ;;  %v919_v27 = vrot.slane %v918_v24, 4 }
 0x325   :  { %v908_v28 = vrot.slane %v907_v25, 2  ;;  %v920_v26 = vadd.f32 %v919_v27, %v918_v24 }
 0x327   :  { %v909_v29 = vadd.f32 %v908_v28, %v907_v25  ;;  %v921_v36 = vrot.slane %v920_v26, 2 }
 0x329   :  { %v910_v30 = vrot.slane %v909_v29, 1  ;;  %v922_v35 = vadd.f32 %v921_v36, %v920_v26 }
 0x32b   :  { %v923_v31 = vrot.slane %v922_v35, 1  ;;  %v911_v32 = vadd.f32 %v910_v30, %v909_v29 }
 0x32d   :  { %v924_v33 = vadd.f32 %v923_v31, %v922_v35 }
 0x32f   :  { %v925_v34 = vsel %vm440_vm1, %v911_v32, %v924_v33 }
 0x330   :  { %1543 = vmatmul.mubr.f32.vlgmr.msra.gmra.mxu1 %v925_v34 }
 0x3f0   :  { %v1008_v37 = vpop.f32.mrf.mxu1 }
 0x3f1   :  { %v1012_v38 = vmul.f32 %v1008_v37, %v1008_v37  ;;  %v1030_v44 = vrot.slane %v1008_v37, %v545_v55 }
 0x3f2   :  { %v1544_v39 = vpop.f32.mrf.mxu1 }
 0x3f3   :  { %v1014_v40 = vrot.slane %v1012_v38, 7  ;;  %v1031_v62 = vsub.f32 %v899_v56, %v1030_v44  ;;  %v1032_v63 = vsub.f32 %v900_v53, %v1030_v44  ;;  %v1033_v1 = vsub.f32 %v901_v16, %v1030_v44 }
 0x3f4   :  { %v1034_v2 = vsub.f32 %v902_v15, %v1030_v44 }
 0x3f5   :  { %v1016_v41 = vsub.f32 %v1008_v37, %v1014_v40 }
 0x3f7   :  { %v1017_v42 = vadd.f32 1e-05, %v1016_v41 }
 0x3f9   :  { %1556 = vrsqrt.f32 %v1017_v42 }
 0x406   :  { %v1557_v45 = vpop.eup %1556 }
 0x407   :  { %v1026_v61 = vmul.f32 %v1557_v45, %v1091_v43 }
 0x409   :  { %v1038_v3 = vrot.slane %v1026_v61, %v553_v58 }
 0x40b   :  { %v1039_v5 = vmul.f32 %v1038_v3, %v1031_v62  ;;  %v1040_v6 = vmul.f32 %v1038_v3, %v1032_v63  ;;  %v1041_v7 = vmul.f32 %v1038_v3, %v1033_v1  ;;  %v1042_v8 = vmul.f32 %v1038_v3, %v1034_v2 }
 0x40d   :  { %v1050_v9 = vadd.f32 %v1092_v4, %v1039_v5  ;;  %v1051_v10 = vadd.f32 %v1092_v4, %v1040_v6  ;;  %v1052_v55 = vadd.f32 %v1092_v4, %v1041_v7  ;;  %v1053_v46 = vadd.f32 %v1092_v4, %v1042_v8 }
 0x40f   :  { %v1058_v48 = vadd.f32 %v1558_v47, %v1050_v9  ;;  %v1059_v50 = vadd.f32 %v1559_v49, %v1051_v10  ;;  %v1060_v58 = vadd.f32 %v1560_v54, %v1052_v55  ;;  %v1061_v52 = vadd.f32 %v1561_v51, %v1053_v46 }
 0x411   :  { %v1062_v11 = vmax.f32 %v1058_v48, 0.0  ;;  %v1063_v53 = vmax.f32 %v1059_v50, 0.0  ;;  %v1064_v56 = vmax.f32 %v1060_v58, 0.0  ;;  %v1065_v57 = vmax.f32 %v1061_v52, 0.0 }
 0x413   :  { %1066 = vst [vmem:[#allocation12] sm:$0xff] %v1062_v11  ;;  %1067 = vst [vmem:[#allocation12 + $0x8] sm:$0xff] %v1063_v53 }
 0x414   :  { %1068 = vst [vmem:[#allocation12 + $0x10] sm:$0xff] %v1064_v56  ;;  %1069 = vst [vmem:[#allocation12 + $0x18] sm:$0xff] %v1065_v57 }
 0x415   :  { %1653 = shalt.err (!%p1650_p10)
}
 0x416   :  { %1081 = dma.vmem_to_hbm [thread:$0]  %s1076_s29, 512, %s1932_s8, [#allocation6], %s1672_s10, %s1672_s10, %s1673_s11  }
 0x417   :  { %1668 = dma.done.wait [#allocation6], 512  }
 0x418   :  { %1669 = vsyncadd [#allocation6], 4294966784 }
 0x419   :  { %1085 = vsyncpa [#allocation5], 1 }
 0x41a   :  { %1086 = vsyncpa [#allocation8], 1 }
 0x41b   :  { %1087 = vsyncpa [#allocation11], 1 }
 0x41c   :  { %1088 = vsyncpa [#allocation6], 1 }

</bundles_post_ra>
